<compile_context>
chip_gen: v7x
topology: tpu7x:2x2x1
jax: 0.10.0
libtpu: 0.0.40
codegen_flags: <defaults>
</compile_context>

<pallas_src>
import functools

import jax
import jax.numpy as jnp
from jax.experimental import pallas as pl
from jax.experimental.pallas import tpu as pltpu

# ---- model hyper-parameters (small, consistent with the module) ----
VOCAB_SIZE = 50
WORD_DIM = 32          # word_dim
SENT_LEN = 30          # sentence_length  (conv output = 28, matches AvgPool1d(28))
KSIZE = 3              # conv1 kernel_size
POOL = 28              # AvgPool1d kernel_size (hard-coded in the module)
NCLASS = 2             # fc output classes
BATCH = 2

L_CONV = SENT_LEN - KSIZE + 1          # 28
P = L_CONV // POOL                     # 1  (number of pooled positions)

_HI = jax.lax.Precision.HIGHEST        # true-f32 matmul semantics (PyTorch parity)


def cnn_kernel(ids_ref, table_ref, bias_ref, out_ref,
               *, B, L, V, pool, npool, ksize, nclass):
    """Single invocation — whole batch resident in VMEM.

    ids_ref   : (B*L, 1)             int32  token ids (flattened)
    table_ref : (V, ksize*nclass)    f32    embedding table fused with conv + fc
    bias_ref  : (1, nclass)          f32    fused bias  (fc_w @ conv_b + fc_b)
    out_ref   : (B*npool, nclass)    f32    softmax probabilities
    """
    C = ksize * nclass
    lu = npool * pool          # conv length actually consumed by the pooling

    # --- Embedding gather as a one-hot MXU matmul (the safe TPU gather). ---
    # The table already carries the conv and fc projections, so this is the
    # ONLY matmul in the kernel.
    # NOTE: ids outside [0, V) silently map to a zero row (unlike nn.Embedding,
    # which would raise); callers must pass valid ids.
    ids = ids_ref[...]                                              # (B*L, 1)
    iota = jax.lax.broadcasted_iota(jnp.int32, (B * L, V), 1)       # (B*L, V)
    onehot = (ids == iota).astype(jnp.float32)
    proj = jnp.dot(onehot, table_ref[...],
                   preferred_element_type=jnp.float32)              # (B*L, C)
    proj = proj.reshape(B, L, C)

    # --- AvgPool commuted ahead of the (folded) conv: per k, mean over each ---
    # pool window of the k-shifted lane chunk, then a 2-lane add over k.
    # (No lane-axis concatenate: the k-chunks are already adjacent lane pairs.)
    logits = bias_ref[...]                                          # (1, nclass)
    for k in range(ksize):
        chunk = proj[:, k:k + lu, k * nclass:(k + 1) * nclass]      # (B, lu, nclass)
        pooled = chunk.reshape(B, npool, pool, nclass).mean(axis=2) # (B, npool, nclass)
        logits = logits + pooled.reshape(B * npool, nclass)         # (B*npool, nclass)

    # --- Softmax over the class dim (PyTorch dim=2), exact reciprocal. ---
    m = jnp.max(logits, axis=-1, keepdims=True)
    e = jnp.exp(logits - m)
    probs = e / jnp.sum(e, axis=-1, keepdims=True)

    # (B*npool, 2) is only 2 lanes wide -> this lowers to one masked vst; at
    # this size padding to 128 lanes would cost more than it saves.  If batch
    # scales, keep B*npool a multiple of 8 so the store stays one tile write.
    out_ref[...] = probs.astype(out_ref.dtype)


def cnn_forward(token_ids, emb_table, conv_w, conv_b, fc_w, fc_b):
    """token_ids: (B, L) int32.  Returns (B, P, 2) float32 softmax probs."""
    B, L = token_ids.shape
    V, D = emb_table.shape
    nclass = fc_w.shape[0]
    lconv = L - KSIZE + 1
    assert lconv >= POOL, (
        f"sentence_length={L} too short for Conv1d(k={KSIZE}) + AvgPool1d({POOL})")
    npool = lconv // POOL

    # --- one-time wrapper-side weight folding (tiny, pure linear algebra) ---
    conv_w = conv_w.astype(jnp.float32)
    fc_w = fc_w.astype(jnp.float32)
    # w_fold[k, i, o] = sum_co conv_w[co, i, k] * fc_w[o, co]          (K, D, 2)
    w_fold = jnp.einsum('cik,oc->kio', conv_w, fc_w, precision=_HI)
    # table_fused[v, k*nclass + o] = sum_i table[v, i] * w_fold[k, i, o]  (V, 6)
    table_fused = jnp.einsum('vi,kio->vko', emb_table.astype(jnp.float32),
                             w_fold, precision=_HI).reshape(V, KSIZE * nclass)
    # bias_fused[o] = sum_c fc_w[o, c] * conv_b[c] + fc_b[o]             (1, 2)
    bias_fused = (jnp.einsum('oc,c->o', fc_w, conv_b.astype(jnp.float32),
                             precision=_HI)
                  + fc_b.astype(jnp.float32)).reshape(1, nclass)

    ids = token_ids.reshape(B * L, 1).astype(jnp.int32)

    kernel = functools.partial(cnn_kernel, B=B, L=L, V=V,
                               pool=POOL, npool=npool, ksize=KSIZE, nclass=nclass)

    vmem = lambda: pl.BlockSpec(memory_space=pltpu.MemorySpace.VMEM)
    out = pl.pallas_call(
        kernel,
        out_shape=jax.ShapeDtypeStruct((B * npool, nclass), jnp.float32),
        in_specs=[vmem(), vmem(), vmem()],      # 3 operands, whole arrays, no grid
        out_specs=vmem(),
    )(ids, table_fused, bias_fused)

    return out.reshape(B, npool, nclass)


def cnn_reference(token_ids, emb_table, conv_w, conv_b, fc_w, fc_b):
    """Pure-JAX reference mirroring the PyTorch forward (for verification)."""
    emb = jnp.take(emb_table, token_ids, axis=0)               # (B, L, D)
    x = jnp.transpose(emb, (0, 2, 1))                          # (B, D, L)
    # Conv1d
    outs = []
    for t in range(L_CONV):
        window = x[:, :, t:t + KSIZE]                          # (B, D_in, 3)
        outs.append(jnp.einsum('bik,oik->bo', window, conv_w, precision=_HI)
                    + conv_b)
    y = jnp.stack(outs, axis=-1)                               # (B, D_out, L_CONV)
    # AvgPool1d(28)
    y = y[:, :, :P * POOL].reshape(y.shape[0], y.shape[1], P, POOL).mean(-1)
    y = jnp.transpose(y, (0, 2, 1))                            # (B, P, D)
    logits = jnp.einsum('bpd,od->bpo', y, fc_w, precision=_HI) + fc_b
    return jax.nn.softmax(logits, axis=2)                      # (B, P, 2)


if __name__ == "__main__":
    key = jax.random.PRNGKey(0)
    k_tok, k_emb, k_cw, k_cb, k_fw, k_fb = jax.random.split(key, 6)

    token_ids = jax.random.randint(k_tok, (BATCH, SENT_LEN), 0, VOCAB_SIZE,
                                   dtype=jnp.int32)
    emb_table = jax.random.normal(k_emb, (VOCAB_SIZE, WORD_DIM), jnp.float32) * 0.1
    conv_w = jax.random.normal(k_cw, (WORD_DIM, WORD_DIM, KSIZE), jnp.float32) * 0.1
    conv_b = jax.random.normal(k_cb, (WORD_DIM,), jnp.float32) * 0.1
    fc_w = jax.random.normal(k_fw, (NCLASS, WORD_DIM), jnp.float32) * 0.1
    fc_b = jax.random.normal(k_fb, (NCLASS,), jnp.float32) * 0.1

    out = cnn_forward(token_ids, emb_table, conv_w, conv_b, fc_w, fc_b)
    out = jax.block_until_ready(out)

    ref = cnn_reference(token_ids, emb_table, conv_w, conv_b, fc_w, fc_b)
    assert out.shape == (BATCH, P, NCLASS), out.shape
    # Exact-reciprocal softmax removes the previous 2e-3 slack; the remaining
    # tolerance only covers default-precision MXU rounding of the one-hot
    # gather matmul plus f32 reassociation from the weight folding.
    assert jnp.allclose(out, ref, atol=1e-3, rtol=1e-3), (out, ref)

    print("KERNEL_OK")
</pallas_src>

<mosaic_0001>
module attributes {stable_mosaic.version = 11 : i64} {
  func.func @cnn_kernel(%arg0: memref<60x1xi32, #tpu.memory_space<vmem>>, %arg1: memref<50x6xf32, #tpu.memory_space<vmem>>, %arg2: memref<1x2xf32, #tpu.memory_space<vmem>>, %arg3: memref<2x2xf32, #tpu.memory_space<vmem>>) attributes {dimension_semantics = [], scalar_prefetch = 0 : i64, scratch_operands = 0 : i64, tpu.core_type = #tpu.core_type<tc>} {
    %c0 = arith.constant 0 : index
    %c0_0 = arith.constant 0 : index
    %0 = vector.load %arg0[%c0, %c0_0] : memref<60x1xi32, #tpu.memory_space<vmem>>, vector<60x1xi32>
    %1 = tpu.iota {dimensions = array<i32: 1>} : vector<60x50xi32>
    %2 = vector.broadcast %0 : vector<60x1xi32> to vector<60x50xi32>
    %3 = arith.cmpi eq, %2, %1 : vector<60x50xi32>
    %4 = arith.extui %3 : vector<60x50xi1> to vector<60x50xi32>
    %5 = arith.sitofp %4 : vector<60x50xi32> to vector<60x50xf32>
    %c0_1 = arith.constant 0 : index
    %c0_2 = arith.constant 0 : index
    %6 = vector.load %arg1[%c0_1, %c0_2] : memref<50x6xf32, #tpu.memory_space<vmem>>, vector<50x6xf32>
    %cst = arith.constant dense<0.000000e+00> : vector<60x6xf32>
    %7 = tpu.matmul %5, %6, %cst {dimension_numbers = #tpu.dot_dimension_numbers<[1], [0], [0], [1], [0, 0, 1, 1], [], []>} : vector<60x50xf32>, vector<50x6xf32>, vector<60x6xf32> -> vector<60x6xf32>
    %8 = vector.shape_cast %7 : vector<60x6xf32> to vector<2x30x6xf32>
    %c0_3 = arith.constant 0 : index
    %c0_4 = arith.constant 0 : index
    %9 = vector.load %arg2[%c0_3, %c0_4] : memref<1x2xf32, #tpu.memory_space<vmem>>, vector<1x2xf32>
    %10 = vector.extract_strided_slice %8 {offsets = [0, 0, 0], sizes = [2, 28, 2], strides = [1, 1, 1]} : vector<2x30x6xf32> to vector<2x28x2xf32>
    %11 = vector.shape_cast %10 : vector<2x28x2xf32> to vector<2x1x28x2xf32>
    %cst_5 = arith.constant dense<0.000000e+00> : vector<2x1x2xf32>
    %12 = vector.multi_reduction <add>, %11, %cst_5 [2] : vector<2x1x28x2xf32> to vector<2x1x2xf32>
    %cst_6 = arith.constant 2.800000e+01 : f32
    %13 = vector.broadcast %cst_6 : f32 to vector<2x1x2xf32>
    %14 = arith.divf %12, %13 : vector<2x1x2xf32>
    %15 = vector.shape_cast %14 : vector<2x1x2xf32> to vector<2x2xf32>
    %16 = vector.broadcast %9 : vector<1x2xf32> to vector<2x2xf32>
    %17 = arith.addf %16, %15 : vector<2x2xf32>
    %18 = vector.extract_strided_slice %8 {offsets = [0, 1, 2], sizes = [2, 28, 2], strides = [1, 1, 1]} : vector<2x30x6xf32> to vector<2x28x2xf32>
    %19 = vector.shape_cast %18 : vector<2x28x2xf32> to vector<2x1x28x2xf32>
    %cst_7 = arith.constant dense<0.000000e+00> : vector<2x1x2xf32>
    %20 = vector.multi_reduction <add>, %19, %cst_7 [2] : vector<2x1x28x2xf32> to vector<2x1x2xf32>
    %cst_8 = arith.constant 2.800000e+01 : f32
    %21 = vector.broadcast %cst_8 : f32 to vector<2x1x2xf32>
    %22 = arith.divf %20, %21 : vector<2x1x2xf32>
    %23 = vector.shape_cast %22 : vector<2x1x2xf32> to vector<2x2xf32>
    %24 = arith.addf %17, %23 : vector<2x2xf32>
    %25 = vector.extract_strided_slice %8 {offsets = [0, 2, 4], sizes = [2, 28, 2], strides = [1, 1, 1]} : vector<2x30x6xf32> to vector<2x28x2xf32>
    %26 = vector.shape_cast %25 : vector<2x28x2xf32> to vector<2x1x28x2xf32>
    %cst_9 = arith.constant dense<0.000000e+00> : vector<2x1x2xf32>
    %27 = vector.multi_reduction <add>, %26, %cst_9 [2] : vector<2x1x28x2xf32> to vector<2x1x2xf32>
    %cst_10 = arith.constant 2.800000e+01 : f32
    %28 = vector.broadcast %cst_10 : f32 to vector<2x1x2xf32>
    %29 = arith.divf %27, %28 : vector<2x1x2xf32>
    %30 = vector.shape_cast %29 : vector<2x1x2xf32> to vector<2x2xf32>
    %31 = arith.addf %24, %30 : vector<2x2xf32>
    %cst_11 = arith.constant dense<0xFF800000> : vector<2xf32>
    %32 = vector.multi_reduction <maximumf>, %31, %cst_11 [1] : vector<2x2xf32> to vector<2xf32>
    %33 = vector.shape_cast %32 : vector<2xf32> to vector<2x1xf32>
    %34 = vector.broadcast %33 : vector<2x1xf32> to vector<2x2xf32>
    %35 = arith.subf %31, %34 : vector<2x2xf32>
    %36 = math.exp %35 : vector<2x2xf32>
    %cst_12 = arith.constant dense<0.000000e+00> : vector<2xf32>
    %37 = vector.multi_reduction <add>, %36, %cst_12 [1] : vector<2x2xf32> to vector<2xf32>
    %38 = vector.shape_cast %37 : vector<2xf32> to vector<2x1xf32>
    %39 = vector.broadcast %38 : vector<2x1xf32> to vector<2x2xf32>
    %40 = arith.divf %36, %39 : vector<2x2xf32>
    %c0_13 = arith.constant 0 : index
    %c0_14 = arith.constant 0 : index
    %41 = vector.load %arg3[%c0_13, %c0_14] : memref<2x2xf32, #tpu.memory_space<vmem>>, vector<2x2xf32>
    tpu.vector_store %arg3[%c0_13, %c0_14], %40 {strides = array<i32>} : memref<2x2xf32, #tpu.memory_space<vmem>>, vector<2x2xf32>,
    return
  }
}

</mosaic_0001>

<bundles_post_ra>
// kernel: tpu_custom_call.1
= control target key start
LH: loop header
LB: loop body
LE: loop exit
PB: predicated region body
PF: predicated region fallthrough
CT: control target
= control target key end

     0   :  { %v900_v2 = vmov 0   ;;  %s1136_s0 = inlined_call_operand.vmem [shape: s32[60,1], index: 0, kind: input, shape index: {}]   ;;  %s1137_s1 = inlined_call_operand.vmem [shape: f32[50,6], index: 1, kind: input, shape index: {}]   ;;  %s1138_s2 = inlined_call_operand.vmem [shape: f32[1,2], index: 2, kind: input, shape index: {}]   ;;  %s1139_s3 = inlined_call_operand.hbm [shape: f32[2,2], index: 3, kind: output, shape index: {}]  }
   0x1   :  { %v19_v0 = vld [vmem:[%s1136_s0 + $0x20] sm:$0xff]  ;;  %871 = vset.pattern.permute.xlu1 %v900_v2  ;;  %870 = vset.pattern.permute.xlu0 %v900_v2  ;;  %v20_v3 = vld [vmem:[%s1136_s0 + $0x28] sm:$0xff]  ;;  %v75_v7 = vld [vmem:[%s1137_s1 + $0x10] sm:$0xff] }
   0x2   :  { %v15_v1 = vld [vmem:[%s1136_s0] sm:$0xff]  ;;  %38 = vperm.xlu1 %871, %v19_v0   ;;  %v16_v4 = vld [vmem:[%s1136_s0 + $0x8] sm:$0xff]  ;;  %v76_v8 = vld [vmem:[%s1137_s1 + $0x18] sm:$0xff] }
   0x3   :  { %26 = vperm.xlu0 %870, %v15_v1   ;;  %v73_v5 = vld [vmem:[%s1137_s1] sm:$0xff]  ;;  %v74_v6 = vld [vmem:[%s1137_s1 + $0x8] sm:$0xff] }
   0x4   :  { %v844_v9 = vpack.c.bf16 %v74_v6, %v73_v5 }
   0x5   :  { %8 = vsyncpa [#allocation3], 0  ;;  %v848_v10 = vpack.c.bf16 %v76_v8, %v75_v7  ;;  %v77_v11 = vld [vmem:[%s1137_s1 + $0x20] sm:$0xff]  ;;  %v78_v12 = vld [vmem:[%s1137_s1 + $0x28] sm:$0xff]  ;;  %vm105_vm0 = vcmask 1041408   ;;  %v23_v19 = vlaneseq  ;;  %vm80_vm1 = vcmask 408576  }
   0x6   :  { %41 = vperm.xlu1 %871, %v20_v3   ;;  %v18_v13 = vld [vmem:[%s1136_s0 + $0x18] sm:$0xff]  ;;  %v17_v14 = vld [vmem:[%s1136_s0 + $0x10] sm:$0xff]  ;;  %845 = vmatprep.subr.bf16.mxu0 %v844_v9  ;;  %v852_v15 = vpack.c.bf16 %v78_v12, %v77_v11  ;;  %v901_v23 = vmov 0.0   ;;  %v902_v38 = vmov 1983009808   ;;  %vm476_vm10 = vcmask 15360  }
   0x7   :  { %29 = vperm.xlu0 %870, %v16_v4   ;;  %856 = vmatprep.subr.bf16.mxu1 %v844_v9  ;;  %v22_v16 = vld [vmem:[%s1136_s0 + $0x38] sm:$0xf]  ;;  %v21_v17 = vld [vmem:[%s1136_s0 + $0x30] sm:$0xff]  ;;  %v24_v20 = vand.u32 127, %v23_v19  ;;  %v224_v39 = vunpack.c.l.s4 %v902_v38  ;;  %v227_v41 = vshrl.u32 %v23_v19, 7  ;;  %vm721_vm11 = vcmask 48160  }
   0x8   :  { %847 = vmatpush3.bf16.msra.mxu0 %v844_v9  ;;  %860 = vmatpush3.bf16.msra.mxu1 %v844_v9  ;;  %v79_v18 = vld [vmem:[%s1137_s1 + $0x30] sm:$0x3]  ;;  %vm482_vm12 = vcmask 11264   ;;  %vm727_vm13 = vcmask 44064   ;;  %vm535_vm14 = vcmask 1046528   ;;  %vm558_vm15 = vcmask 31760  }
   0x9   :  { %849 = vmatprep.subr.bf16.mxu0 %v848_v10  ;;  %857 = vmatprep.subr.bf16.mxu1 %v848_v10  ;;  %v225_v40 = vunpack.c.0.s8 %v224_v39  ;;  %s903_s0 = smov 124   ;;  %s904_s1 = smov 126  }
   0xa   :  { %35 = vperm.xlu1 %871, %v18_v13  }
   0xb   :  { %32 = vperm.xlu0 %870, %v17_v14   ;;  %v979_v42 = vsub.s32 %v225_v40, %v227_v41 }
   0xc   :  { %851 = vmatpush3.bf16.msra.mxu0 %v848_v10  ;;  %861 = vmatpush3.bf16.msra.mxu1 %v848_v10 }
   0xd   :  { %853 = vmatprep.subr.bf16.mxu0 %v852_v15  ;;  %858 = vmatprep.subr.bf16.mxu1 %v852_v15 }
   0xe   :  { %47 = vperm.xlu1 %871, %v22_v16  }
   0xf   :  { %44 = vperm.xlu0 %870, %v21_v17  }
  0x10   :  { %855 = vmatpush3.bf16.msra.mxu0 %v852_v15  ;;  %862 = vmatpush3.bf16.msra.mxu1 %v852_v15 }
  0x11   :  { %830 = vmatprep.subr.msk.mxu0 %vm105_vm0, %v79_v18  ;;  %859 = vmatprep.subr.msk.mxu1 %vm105_vm0, %v79_v18 }
  0x14   :  { %831 = vmatpush3.msk.msra.mxu0 %vm105_vm0, %v79_v18  ;;  %863 = vmatpush3.msk.msra.mxu1 %vm105_vm0, %v79_v18  ;;  %vm564_vm0 = vcmask 27664  }
  0x81   :  { %v39_v21 = vpop.permute.xlu1 %38 }
  0x82   :  { %v27_v22 = vpop.permute.xlu0 %26  ;;  %vm53_vm2 = vcmp.eq.s32.totalorder %v39_v21, %v24_v20 }
  0x83   :  { %vm49_vm3 = vcmp.eq.s32.totalorder %v27_v22, %v24_v20  ;;  %v789_v25 = vsel %vm53_vm2, 1.0, %v901_v23  ;;  %vm758_vm2 = vcmask 9216  }
  0x84   :  { %v785_v24 = vsel %vm49_vm3, 1.0, %v901_v23  ;;  %838 = vmatprep.mubr.msk.f32.mxu1 %vm80_vm1, %v789_v25 }
  0x85   :  { %832 = vmatprep.mubr.msk.f32.mxu0 %vm80_vm1, %v785_v24  ;;  %v42_v26 = vpop.permute.xlu1 %41 }
  0x86   :  { %v30_v27 = vpop.permute.xlu0 %29  ;;  %vm54_vm4 = vcmp.eq.s32.totalorder %v42_v26, %v24_v20 }
  0x87   :  { %vm50_vm5 = vcmp.eq.s32.totalorder %v30_v27, %v24_v20  ;;  %v790_v28 = vsel %vm54_vm4, 1.0, %v901_v23 }
  0x88   :  { %v786_v29 = vsel %vm50_vm5, 1.0, %v901_v23  ;;  %839 = vmatmul.mubr.msk.f32.vlgmr.msra.gmra.mrb[0].mxu1 %vm80_vm1, %v790_v28 }
  0x89   :  { %833 = vmatmul.mubr.msk.f32.vlgmr.msra.gmra.mrb[0].mxu0 %vm80_vm1, %v786_v29  ;;  %v36_v30 = vpop.permute.xlu1 %35 }
  0x8a   :  { %v33_v31 = vpop.permute.xlu0 %32  ;;  %vm52_vm6 = vcmp.eq.s32.totalorder %v36_v30, %v24_v20 }
  0x8b   :  { %vm51_vm7 = vcmp.eq.s32.totalorder %v33_v31, %v24_v20  ;;  %v788_v32 = vsel %vm52_vm6, 1.0, %v901_v23 }
  0x8c   :  { %v787_v33 = vsel %vm51_vm7, 1.0, %v901_v23 }
  0x8d   :  { %835 = vmatprep.mubr.msk.f32.mxu0 %vm80_vm1, %v787_v33  ;;  %v48_v34 = vpop.permute.xlu1 %47 }
  0x8e   :  { %836 = vmatmul.mubr.msk.f32.gmra.mrb[2].mxu0 %vm80_vm1, %v788_v32  ;;  %v45_v35 = vpop.permute.xlu0 %44  ;;  %vm56_vm8 = vcmp.eq.s32.totalorder %v48_v34, %v24_v20 }
  0x8f   :  { %vm55_vm9 = vcmp.eq.s32.totalorder %v45_v35, %v24_v20  ;;  %v792_v36 = vsel %vm56_vm8, 1.0, %v901_v23 }
  0x90   :  { %v791_v37 = vsel %vm55_vm9, 1.0, %v901_v23 }
  0x91   :  { %841 = vmatprep.mubr.msk.f32.mxu1 %vm80_vm1, %v791_v37 }
  0x92   :  { %842 = vmatmul.mubr.msk.f32.gmra.mrb[2].mxu1 %vm80_vm1, %v792_v36  ;;  %vm515_vm1 = vcmask 1041409  }
 0x15b   :  { %v840_v44 = vpop.f32.mrb[0].mxu1 }
 0x15c   :  { %v834_v43 = vpop.f32.mrb[0].mxu0  ;;  %v307_v47 = vcombine.high %v840_v44, %v840_v44  ;;  %v314_v48 = vrot.slane %v840_v44, %v979_v42  ;;  %v195_v50 = vpop.f32.mrb[1].mxu1 }
 0x15d   :  { %v239_v45 = vcombine.high %v834_v43, %v834_v43  ;;  %v246_v46 = vrot.slane %v834_v43, %v979_v42  ;;  %v175_v49 = vpop.f32.mrb[1].mxu0  ;;  %v290_v53 = vcombine.high %v195_v50, %v195_v50  ;;  %v297_v54 = vrot.slane %v195_v50, %v979_v42 }
 0x15e   :  { %v222_v51 = vcombine.high %v175_v49, %v175_v49  ;;  %v229_v52 = vrot.slane %v175_v49, %v979_v42  ;;  %v989_v57 = vrot.slane %v307_v47, %v979_v42  ;;  %v322_v58 = vcombine.high %v314_v48, %v314_v48 }
 0x15f   :  { %v986_v55 = vrot.slane %v239_v45, %v979_v42  ;;  %v254_v56 = vcombine.high %v246_v46, %v246_v46  ;;  %v304_v61 = vrot.slane %v290_v53, %v979_v42  ;;  %v305_v62 = vcombine.high %v297_v54, %v297_v54 }
 0x160   :  { %v236_v59 = vrot.slane %v222_v51, %v979_v42  ;;  %v237_v60 = vcombine.high %v229_v52, %v229_v52  ;;  %v427_v1 = vcombine.low %v322_v58, %v989_v57  ;;  %v671_v2 = vcombine.low %v314_v48, %v322_v58 }
 0x161   :  { %v367_v63 = vcombine.low %v246_v46, %v254_v56  ;;  %v612_v0 = vcombine.low %v254_v56, %v986_v55  ;;  %v837_v3 = vpop.f32.mrb[2].mxu0  ;;  %v306_v7 = vcombine.high %v304_v61, %v304_v61  ;;  %v410_v17 = vcombine.low %v305_v62, %v304_v61 }
 0x162   :  { %v238_v4 = vcombine.high %v236_v59, %v236_v59  ;;  %v350_v5 = vcombine.low %v229_v52, %v237_v60  ;;  %v595_v6 = vcombine.low %v237_v60, %v236_v59  ;;  %v185_v8 = vpop.f32.mrb[3].mxu0  ;;  %v441_v11 = vrot.slane %v427_v1, %v979_v42 }
 0x163   :  { %v375_v9 = vrot.slane %v367_v63, %v979_v42  ;;  %v997_v10 = vrot.slane %v612_v0, %v979_v42  ;;  %v1001_v12 = vrot.slane %v671_v2, %v979_v42  ;;  %v426_v18 = vcombine.low %v306_v7, %v314_v48 }
 0x164   :  { %v351_v13 = vcombine.low %v236_v59, %v238_v4  ;;  %v358_v14 = vrot.slane %v350_v5, %v979_v42  ;;  %v596_v15 = vcombine.low %v238_v4, %v246_v46  ;;  %v603_v16 = vrot.slane %v595_v6, %v979_v42 }
 0x165   :  { %v654_v19 = vcombine.low %v297_v54, %v305_v62  ;;  %v655_v20 = vcombine.low %v304_v61, %v306_v7  ;;  %v843_v21 = vpop.f32.mrb[2].mxu1  ;;  %v273_v24 = vcombine.high %v837_v3, %v837_v3  ;;  %v280_v25 = vrot.slane %v837_v3, %v979_v42 }
 0x166   :  { %v365_v22 = vrot.slane %v351_v13, %v979_v42  ;;  %v610_v23 = vrot.slane %v596_v15, %v979_v42  ;;  %v1008_v26 = vpop.f32.mrb[3].mxu1  ;;  %v424_v27 = vrot.slane %v410_v17, %v979_v42  ;;  %v434_v28 = vrot.slane %v426_v18, %v979_v42 }
 0x167   :  { %v1013_v29 = vrot.slane %v654_v19, %v979_v42  ;;  %v1016_v30 = vrot.slane %v655_v20, %v979_v42  ;;  %v287_v33 = vrot.slane %v273_v24, %v979_v42  ;;  %v288_v34 = vcombine.high %v280_v25, %v280_v25 }
 0x168   :  { %v1018_v31 = vcombine.low %v358_v14, %v365_v22  ;;  %v611_v32 = vcombine.low %v603_v16, %v610_v23  ;;  %v1021_v35 = vcombine.low %v434_v28, %v441_v11  ;;  %v255_v37 = vcombine.high %v986_v55, %v986_v55 }
 0x169   :  { %v670_v36 = vcombine.low %v1013_v29, %v1016_v30  ;;  %v256_v38 = vcombine.high %v185_v8, %v185_v8  ;;  %v289_v39 = vcombine.high %v287_v33, %v287_v33  ;;  %v401_v43 = vcombine.low %v280_v25, %v288_v34 }
 0x16a   :  { %v477_v40 = vsel %vm476_vm10, %v1018_v31, 0.0  ;;  %v536_v41 = vrot.slane %v1018_v31, 1  ;;  %v525_v44 = vrot.slane %v287_v33, %v979_v42  ;;  %v646_v46 = vcombine.low %v288_v34, %v287_v33 }
 0x16b   :  { %v409_v45 = vcombine.low %v289_v39, %v297_v54  ;;  %v263_v47 = vrot.slane %v185_v8, %v979_v42  ;;  %v270_v48 = vrot.slane %v256_v38, %v979_v42  ;;  %v722_v49 = vsel %vm721_vm11, %v611_v32, 0.0 }
 0x16c   :  { %v408_v50 = vrot.slane %v401_v43, %v979_v42  ;;  %v368_v51 = vcombine.low %v986_v55, %v255_v37  ;;  %v1037_v52 = vrot.slane %v843_v21, %v979_v42  ;;  %v653_v56 = vrot.slane %v646_v46, %v979_v42 }
 0x16d   :  { %v417_v53 = vrot.slane %v409_v45, %v979_v42  ;;  %v271_v58 = vcombine.high %v263_v47, %v263_v47  ;;  %v272_v54 = vcombine.high %v270_v48, %v270_v48  ;;  %v544_v59 = vrot.slane %v1021_v35, 1 }
 0x16e   :  { %v1042_v60 = vcombine.low %v408_v50, %v525_v44  ;;  %v382_v61 = vrot.slane %v368_v51, %v979_v42  ;;  %v613_v62 = vcombine.low %v255_v37, %v263_v47  ;;  %v323_v5 = vcombine.high %v989_v57, %v989_v57 }
 0x16f   :  { %v425_v63 = vcombine.low %v417_v53, %v424_v27  ;;  %v384_v55 = vcombine.low %v263_v47, %v271_v58  ;;  %v385_v0 = vcombine.low %v270_v48, %v272_v54  ;;  %v629_v1 = vcombine.low %v271_v58, %v270_v48 }
 0x170   :  { %v383_v2 = vcombine.low %v375_v9, %v382_v61  ;;  %v627_v3 = vrot.slane %v613_v62, %v979_v42  ;;  %v630_v4 = vcombine.low %v272_v54, %v280_v25  ;;  %v483_v6 = vsel %vm482_vm12, %v408_v50, 0.0 }
 0x171   :  { %v392_v7 = vrot.slane %v384_v55, %v979_v42  ;;  %v399_v8 = vrot.slane %v385_v0, %v979_v42  ;;  %v637_v11 = vrot.slane %v629_v1, %v979_v42  ;;  %v541_v13 = vrot.slane %v1042_v60, 1 }
 0x172   :  { %v543_v14 = vrot.slane %v425_v63, 1  ;;  %v478_v15 = vsel %vm476_vm10, %v383_v2, 0.0  ;;  %v628_v9 = vcombine.low %v997_v10, %v627_v3  ;;  %v644_v18 = vrot.slane %v630_v4, %v979_v42 }
 0x173   :  { %v400_v16 = vcombine.low %v392_v7, %v399_v8  ;;  %v479_v17 = vadd.f32 %v478_v15, %v477_v40  ;;  %v348_v19 = vcombine.high %v1037_v52, %v1037_v52  ;;  %v537_v20 = vrot.slane %v383_v2, 1 }
 0x174   :  { %v723_v21 = vsel %vm721_vm11, %v628_v9, 0.0  ;;  %v324_v22 = vcombine.high %v1008_v26, %v1008_v26  ;;  %v331_v23 = vrot.slane %v1008_v26, %v979_v42  ;;  %v645_v10 = vcombine.low %v637_v11, %v644_v18 }
 0x175   :  { %v480_v24 = vsel %vm476_vm10, %v400_v16, 0.0  ;;  %v539_v25 = vrot.slane %v400_v16, 1  ;;  %v724_v27 = vadd.f32 %v723_v21, %v722_v49  ;;  %v533_v32 = vrot.slane %v348_v19, %v979_v42 }
 0x176   :  { %v481_v28 = vadd.f32 %v480_v24, %v479_v17  ;;  %v705_v33 = vcombine.low %v1037_v52, %v348_v19  ;;  %v338_v34 = vrot.slane %v324_v22, %v979_v42  ;;  %v725_v26 = vsel %vm721_vm11, %v645_v10, 0.0 }
 0x177   :  { %v540_v37 = vsel %vm535_vm14, %v537_v20, %v539_v25  ;;  %v542_v38 = vsel %vm535_vm14, %v539_v25, %v541_v13  ;;  %v339_v39 = vcombine.high %v331_v23, %v331_v23  ;;  %v726_v44 = vadd.f32 %v725_v26, %v724_v27 }
 0x178   :  { %v484_v40 = vadd.f32 %v483_v6, %v481_v28  ;;  %v712_v43 = vrot.slane %v705_v33, %v979_v42  ;;  %v728_v45 = vsel %vm727_vm13, %v653_v56, 0.0  ;;  %v340_v46 = vcombine.high %v338_v34, %v338_v34 }
 0x179   :  { %v443_v47 = vcombine.low %v323_v5, %v331_v23  ;;  %v444_v48 = vcombine.low %v339_v39, %v338_v34  ;;  %v491_v49 = vsel %vm476_vm10, %v425_v63, 0.0  ;;  %v736_v50 = vsel %vm721_vm11, %v670_v36, 0.0 }
 0x17a   :  { %v729_v51 = vadd.f32 %v728_v45, %v726_v44  ;;  %v492_v53 = vsel %vm476_vm10, %v1021_v35, 0.0  ;;  %v672_v58 = vcombine.low %v989_v57, %v323_v5  ;;  %v460_v61 = vcombine.low %v340_v46, %v1037_v52 }
 0x17b   :  { %v451_v54 = vrot.slane %v443_v47, %v979_v42  ;;  %v458_v56 = vrot.slane %v444_v48, %v979_v42  ;;  %v493_v62 = vadd.f32 %v492_v53, %v491_v49  ;;  %v688_v55 = vcombine.low %v331_v23, %v339_v39 }
 0x17c   :  { %v686_v63 = vrot.slane %v672_v58, %v979_v42  ;;  %v689_v0 = vcombine.low %v338_v34, %v340_v46  ;;  %v730_v29 = vrot.slane %v729_v51, 4  ;;  %v467_v36 = vrot.slane %v460_v61, %v979_v42 }
 0x17d   :  { %v459_v30 = vcombine.low %v451_v54, %v458_v56  ;;  %v538_v1 = vsel %vm535_vm14, %v536_v41, %v537_v20  ;;  %v545_v57 = vsel %vm535_vm14, %v543_v14, %v544_v59  ;;  %v696_v52 = vrot.slane %v688_v55, %v979_v42 }
 0x17e   :  { %v687_v2 = vcombine.low %v1001_v12, %v686_v63  ;;  %v703_v3 = vrot.slane %v689_v0, %v979_v42  ;;  %v731_v4 = vadd.f32 %v730_v29, %v729_v51  ;;  %v560_v5 = vsel %vm558_vm15, %v540_v37, 0.0 }
 0x17f   :  { %v494_v6 = vsel %vm476_vm10, %v459_v30, 0.0  ;;  %v534_v7 = vcombine.low %v467_v36, %v533_v32  ;;  %v546_v8 = vrot.slane %v459_v30, 1  ;;  %v496_v41 = vsel %vm482_vm12, %v467_v36, 0.0 }
 0x180   :  { %v495_v31 = vadd.f32 %v494_v6, %v493_v62  ;;  %v704_v11 = vcombine.low %v696_v52, %v703_v3  ;;  %v737_v15 = vsel %vm721_vm11, %v687_v2, 0.0  ;;  %v732_v42 = vrot.slane %v731_v4, 2 }
 0x181   :  { %v547_v12 = vsel %vm535_vm14, %v544_v59, %v546_v8  ;;  %v548_v14 = vrot.slane %v534_v7, 1  ;;  %v738_v9 = vadd.f32 %v737_v15, %v736_v50  ;;  %v559_v19 = vsel %vm558_vm15, %v538_v1, 0.0 }
 0x182   :  { %v497_v16 = vadd.f32 %v496_v41, %v495_v31  ;;  %v574_v17 = vsel %vm558_vm15, %v547_v12, 0.0  ;;  %v739_v18 = vsel %vm721_vm11, %v704_v11, 0.0  ;;  %v561_v22 = vadd.f32 %v560_v5, %v559_v19 }
 0x183   :  { %v549_v20 = vsel %vm535_vm14, %v546_v8, %v548_v14  ;;  %v740_v21 = vadd.f32 %v739_v18, %v738_v9  ;;  %v741_v23 = vsel %vm727_vm13, %v712_v43, 0.0  ;;  %v562_v35 = vsel %vm558_vm15, %v542_v38, 0.0 }
 0x184   :  { %v573_v59 = vsel %vm558_vm15, %v545_v57, 0.0  ;;  %v576_v24 = vsel %vm558_vm15, %v549_v20, 0.0  ;;  %v563_v10 = vadd.f32 %v562_v35, %v561_v22  ;;  %v485_v28 = vrot.slane %v484_v40, 4 }
 0x185   :  { %v742_v25 = vadd.f32 %v741_v23, %v740_v21  ;;  %v575_v27 = vadd.f32 %v574_v17, %v573_v59  ;;  %v565_v32 = vsel %vm564_vm0, %v541_v13, 0.0  ;;  %v733_v33 = vadd.f32 %v732_v42, %v731_v4 }
 0x186   :  { %v498_v34 = vrot.slane %v497_v16, 4  ;;  %v566_v26 = vadd.f32 %v565_v32, %v563_v10  ;;  %v486_v43 = vadd.f32 %v485_v28, %v484_v40  ;;  %v578_v38 = vsel %vm564_vm0, %v548_v14, 0.0  ;;  %v802_v14 = vld [vmem:[%s1138_s2] ss:$0 sm:$0xff]  ;;  %s905_s2 = smov [#allocation2]  }
 0x187   :  { %v743_v37 = vrot.slane %v742_v25, 4  ;;  %v577_v39 = vadd.f32 %v576_v24, %v575_v27  ;;  %v734_v49 = vrot.slane %v733_v33, 1  ;;  %s777_s17 = sshll.u32 %s905_s2, 4  ;;  %s778_s17 = int_to_ptr.vmem [resolvable:$true] %s777_s17 }
 0x188   :  { %v499_v44 = vadd.f32 %v498_v34, %v497_v16  ;;  %v567_v46 = vrot.slane %v566_v26, 4  ;;  %v487_v48 = vrot.slane %v486_v43, 2  ;;  %s876_s18 = scalar_lea.vmem %s778_s17, 32  ;;  %p881_p1 = scmp.lt.s32.totalorder %s778_s17, %s778_s17 }
 0x189   :  { %v744_v45 = vadd.f32 %v743_v37, %v742_v25  ;;  %v579_v47 = vadd.f32 %v578_v38, %v577_v39  ;;  %v735_v63 = vadd.f32 %v734_v49, %v733_v33  ;;  %p877_p0 = scmp.ne.s32.totalorder %s778_s17, %s876_s18  ;;  %p882_p2 = scmp.lt.s32.totalorder %s876_s18, %s876_s18 }
 0x18a   :  { %v500_v50 = vrot.slane %v499_v44, 2  ;;  %v568_v53 = vadd.f32 %v567_v46, %v566_v26  ;;  %v488_v58 = vadd.f32 %v487_v48, %v486_v43 }
 0x18b   :  { %v745_v51 = vrot.slane %v744_v45, 2  ;;  %v580_v60 = vrot.slane %v579_v47, 4  ;;  %v749_v4 = vmul.f32 0.035714287, %v735_v63  ;;  %p883_p3 = por %p882_p2, %p881_p1 }
 0x18c   :  { %v501_v13 = vadd.f32 %v500_v50, %v499_v44  ;;  %v569_v56 = vrot.slane %v568_v53, 2  ;;  %v489_v62 = vrot.slane %v488_v58, 1 }
 0x18d   :  { %v746_v54 = vadd.f32 %v745_v51, %v744_v45  ;;  %v581_v61 = vadd.f32 %v580_v60, %v579_v47  ;;  %p884_p4 = pnand %p883_p3, %p877_p0 }
 0x18e   :  { %v502_v40 = vrot.slane %v501_v13, 1  ;;  %v570_v0 = vadd.f32 %v569_v56, %v568_v53  ;;  %v490_v30 = vadd.f32 %v489_v62, %v488_v58 }
 0x18f   :  { %v747_v55 = vrot.slane %v746_v54, 1  ;;  %v582_v29 = vrot.slane %v581_v61, 2 }
 0x190   :  { %v503_v36 = vadd.f32 %v502_v40, %v501_v13  ;;  %v571_v57 = vrot.slane %v570_v0, 1  ;;  %v505_v52 = vmul.f32 0.035714287, %v490_v30 }
 0x191   :  { %v748_v1 = vadd.f32 %v747_v55, %v746_v54  ;;  %v583_v2 = vadd.f32 %v582_v29, %v581_v61 }
 0x192   :  { %v506_v3 = vmul.f32 0.035714287, %v503_v36  ;;  %v572_v6 = vadd.f32 %v571_v57, %v570_v0 }
 0x193   :  { %v750_v5 = vmul.f32 0.035714287, %v748_v1  ;;  %v584_v7 = vrot.slane %v583_v2, 1 }
 0x194   :  { %v516_v8 = vsel %vm515_vm1, %v506_v3, %v505_v52  ;;  %v586_v11 = vmul.f32 0.035714287, %v572_v6 }
 0x195   :  { %v753_v31 = vsel %vm515_vm1, %v750_v5, %v749_v4  ;;  %v585_v41 = vadd.f32 %v584_v7, %v583_v2  ;;  %v518_v9 = vadd.f32 %v802_v14, %v516_v8 }
 0x196   :  { %754 = vrot.lane.b32.xlu1 %v753_v31, %s903_s0 }
 0x197   :  { %v587_v15 = vmul.f32 0.035714287, %v585_v41 }
 0x199   :  { %v590_v12 = vsel %vm515_vm1, %v587_v15, %v586_v11 }
 0x19a   :  { %591 = vrot.lane.b32.xlu0 %v590_v12, %s904_s1 }
 0x208   :  { %v755_v17 = vpop.permute.xlu1 %754 }
 0x20c   :  { %v592_v42 = vpop.permute.xlu0 %591 }
 0x20d   :  { %v594_v16 = vadd.f32 %v592_v42, %v518_v9 }
 0x20f   :  { %v757_v18 = vadd.f32 %v755_v17, %v594_v16 }
 0x211   :  { %v759_v19 = vsel %vm758_vm2, %v757_v18, -inf }
 0x212   :  { %760 = vmax.xlane.f32.xlu0 %v759_v19 }
 0x29f   :  { %v761_v20 = vpop.xlane.xlu0 %760 }
 0x2a0   :  { %v762_v21 = vsub.f32 %v757_v18, %v761_v20 }
 0x2a2   :  { %v763_v22 = vmul.f32 1.442695, %v762_v21 }
 0x2a4   :  { %872 = vpow2.f32 %v763_v22 }
 0x2ae   :  { %v873_v23 = vpop.eup %872 }
 0x2af   :  { %v765_v35 = vsel %vm758_vm2, %v873_v23, 0.0 }
 0x2b0   :  { %766 = vadd.xlane.f32.xlu1 %v765_v35 }
 0x33d   :  { %v767_v59 = vpop.xlane.xlu1 %766 }
 0x33e   :  { %874 = vrcp.f32 %v767_v59 }
 0x348   :  { %v875_v24 = vpop.eup %874 }
 0x349   :  { %v769_v25 = vmul.f32 %v875_v24, %v873_v23 }
 0x34b   :  { %770 = vst.msk [vmem:[#allocation2] sm:$0x3] %vm758_vm2, %v769_v25 }
 0x34c   :  { %887 = shalt.err (!%p884_p4)
}
 0x34d   :  { %s888_s21 = scalar_lea.hbm %s1139_s3, 32 }
 0x34e   :  { %p889_p5 = scmp.ne.s32.totalorder %s1139_s3, %s888_s21  ;;  %p892_p6 = scmp.lt.u32.totalorder %s888_s21, %s1139_s3 }
 0x350   :  { %p894_p7 = pnand %p892_p6, %p889_p5 }
 0x352   :  { %897 = shalt.err (!%p894_p7)
}
 0x353   :  { %780 = dma.vmem_to_hbm [thread:$0]  %s778_s17, 32, %s1139_s3, [#allocation3]  }
 0x354   :  { %898 = dma.done.wait [#allocation3], 32  }
 0x355   :  { %899 = vsyncadd [#allocation3], 4294967264 }
 0x356   :  { %784 = vsyncpa [#allocation3], 1 }

</bundles_post_ra>
